<compile_context>
chip_gen: v7x
topology: tpu7x:2x2x1
jax: 0.10.0
libtpu: 0.0.40
codegen_flags: <defaults>
</compile_context>

<pallas_src>
import functools

import jax
import jax.numpy as jnp
from jax import lax
from jax.experimental import pallas as pl
from jax.experimental.pallas import tpu as pltpu

_MIB = 1024 * 1024
# Per-TensorCore VMEM budget used for tile-mode selection.  48 MiB is safe on
# every generation (v7x: 64 MiB/TC physical; v5e/v6e: 128 MiB physical, but the
# 16/32 MiB default *scoped* limit is raised explicitly via vmem_limit_bytes).
_VMEM_BUDGET = 48 * _MIB


def _round_up(x, m):
    return ((x + m - 1) // m) * m


def _auto_compute_dtype():
    # v5e's MXU has no native f32 mode: bf16 matmul (f32 accumulation) is ~3x
    # faster there.  Other generations keep the faithful f32 path by default.
    try:
        kind = jax.devices()[0].device_kind.lower()
    except Exception:
        return None
    if "v5e" in kind or "v5 lite" in kind or "v5lite" in kind:
        return jnp.bfloat16
    return None


def _token_pooler_kernel(x_ref, w_ref, b_ref, o_ref, *, compute_dtype):
    # x_ref: (TM, Hp) token tile
    # w_ref: (Hp, Hp) or (TN, Hp) weight (PyTorch (out, in) layout, pre-cast)
    # b_ref: (1, Hp) or (1, TN) bias (f32)
    # o_ref: (TM, Hp) or (TM, TN) output tile
    x = x_ref[...]
    if x.dtype != compute_dtype:
        x = x.astype(compute_dtype)          # cheap per-tile cast (no HBM pass)
    # x @ W.T natively on the MXU: contract dim 1 of x with dim 1 of W.
    y = lax.dot_general(
        x, w_ref[...],
        dimension_numbers=(((1,), (1,)), ((), ())),
        preferred_element_type=jnp.float32,
    )
    y = y + b_ref[...].astype(jnp.float32)   # broadcast bias over rows, f32
    o_ref[...] = jnp.tanh(y).astype(o_ref.dtype)


def _tm_candidates(start, m):
    start = max(min(_round_up(start, 8), _round_up(m, 8)), 8)
    cands = [start]
    t = start
    while t > 8:
        t = max(_round_up(t // 2, 8), 8)
        if t < cands[-1]:
            cands.append(t)
    return cands


def _select_tiles(m, hp, xb, wb, ob, tm_req, budget):
    """Pick ('resident', TM, None) or ('ntiled', TM, TN) under the VMEM budget."""
    w_resident = hp * hp * wb + hp * 4
    # Resident-weight path: weight/bias single-buffered, x/out double-buffered.
    for tm in _tm_candidates(tm_req, m):
        if tm < 128 and tm < _round_up(m, 8):
            break  # don't shrink M tiles below 128 just to keep the weight resident
        if w_resident + 2 * tm * hp * (xb + ob) <= budget:
            return "resident", tm, None
    # N-tiled path (large hidden): stream (TN, Hp) weight out-dim blocks with N
    # innermost; a large TM amortizes re-streaming the weight once per M tile.
    for tn in (1024, 512, 256, 128):
        if tn > hp:
            continue
        for tm in _tm_candidates(max(tm_req, 1024), m):
            need = 2 * tn * hp * wb + 2 * tn * 4 + 2 * tm * hp * xb + 2 * tm * tn * ob
            if need <= budget:
                return "ntiled", tm, tn
    # Fallback: smallest tiles (vmem_limit below is computed from actual need).
    return "ntiled", 8, 128 if hp >= 128 else hp


def _vmem_need(mode, tm, tn, hp, xb, wb, ob):
    if mode == "resident":
        return hp * hp * wb + hp * 4 + 2 * tm * hp * (xb + ob)
    return 2 * tn * hp * wb + 2 * tn * 4 + 2 * tm * hp * xb + 2 * tm * tn * ob


def token_pooler(hidden_states, weight, bias, *, tm=512, compute_dtype="auto",
                 vmem_budget_bytes=_VMEM_BUDGET):
    """hidden_states: (B, S, H); weight: (H, H) PyTorch (out, in) layout; bias: (H,).
    Returns tanh(hidden_states @ W.T + b), shape (B, S, H), dtype of hidden_states.

    compute_dtype: None -> full-precision matmul; jnp.bfloat16 -> bf16 MXU matmul
    with f32 accumulation; "auto" -> bf16 on v5e, None elsewhere.
    Pass bf16 hidden_states end-to-end for bf16 activation I/O (no extra cast pass).
    """
    B, S, H = hidden_states.shape
    M = B * S

    if compute_dtype == "auto":
        compute_dtype = _auto_compute_dtype()
    if compute_dtype is not None:
        matmul_dtype = jnp.dtype(compute_dtype)
    else:
        matmul_dtype = jnp.promote_types(hidden_states.dtype, weight.dtype)

    h_pad = _round_up(H, 128)

    # No M padding (Pallas masks the partial last M tile); pad only the hidden
    # dim (and the small weight/bias) when H is not lane-aligned.  Zero padding
    # is exact: padded x columns / padded W rows contribute 0, padded output
    # columns are sliced away.
    x2d = hidden_states.reshape(M, H)
    if h_pad != H:
        x2d = jnp.pad(x2d, ((0, 0), (0, h_pad - H)))
        w_p = jnp.pad(weight, ((0, h_pad - H), (0, h_pad - H)))
        b_p = jnp.pad(bias, (0, h_pad - H))
    else:
        w_p, b_p = weight, bias
    # One-time weight cast in the wrapper (halves weight DMA/VMEM on the bf16
    # path); activations are cast per-tile inside the kernel instead.
    if w_p.dtype != matmul_dtype:
        w_p = w_p.astype(matmul_dtype)
    b2d = b_p.reshape(1, h_pad).astype(jnp.float32)

    x_bytes = jnp.dtype(x2d.dtype).itemsize
    w_bytes = jnp.dtype(w_p.dtype).itemsize
    o_bytes = x_bytes  # output dtype == input dtype

    mode, tm_eff, tn_eff = _select_tiles(
        M, h_pad, x_bytes, w_bytes, o_bytes, tm, vmem_budget_bytes)

    # If one M tile covers everything but there's enough work for 2 cores,
    # split it so v7x megacore can shard row tiles across TensorCores.
    if pl.cdiv(M, tm_eff) == 1 and M >= 512:
        tm_eff = _round_up(pl.cdiv(M, 2), 8)

    need = _vmem_need(mode, tm_eff, tn_eff, h_pad, x_bytes, w_bytes, o_bytes)
    vmem_limit = int(min(max(need + 8 * _MIB, 32 * _MIB), 112 * _MIB))

    kernel = functools.partial(_token_pooler_kernel, compute_dtype=matmul_dtype)

    if mode == "resident":
        grid = (pl.cdiv(M, tm_eff),)
        in_specs = [
            pl.BlockSpec((tm_eff, h_pad), lambda i: (i, 0)),          # streamed x tile
            # Grid-invariant weight & bias: single-buffered, VMEM-resident.
            pl.BlockSpec((h_pad, h_pad), lambda i: (0, 0),
                         pipeline_mode=pl.Buffered(1)),
            pl.BlockSpec((1, h_pad), lambda i: (0, 0),
                         pipeline_mode=pl.Buffered(1)),
        ]
        out_specs = pl.BlockSpec((tm_eff, h_pad), lambda i: (i, 0))
        # TODO(synk): if the v7x trace shows no TC split, switch to pltpu.CORE_PARALLEL.
        dims = ("parallel",)
        w_traffic = h_pad * h_pad * w_bytes
    else:
        # N-tiled path: N innermost so the x tile stays resident across j.
        grid = (pl.cdiv(M, tm_eff), pl.cdiv(h_pad, tn_eff))
        in_specs = [
            pl.BlockSpec((tm_eff, h_pad), lambda i, j: (i, 0)),       # x (resident over j)
            pl.BlockSpec((tn_eff, h_pad), lambda i, j: (j, 0)),       # weight out-dim block
            pl.BlockSpec((1, tn_eff), lambda i, j: (0, j)),           # bias block
        ]
        out_specs = pl.BlockSpec((tm_eff, tn_eff), lambda i, j: (i, j))
        dims = ("parallel", "arbitrary")
        w_traffic = pl.cdiv(M, tm_eff) * h_pad * h_pad * w_bytes

    cost = pl.CostEstimate(
        flops=2 * M * h_pad * h_pad,
        transcendentals=M * h_pad,
        bytes_accessed=int(M * h_pad * (x_bytes + o_bytes) + w_traffic + h_pad * 4),
    )

    out2d = pl.pallas_call(
        kernel,
        out_shape=jax.ShapeDtypeStruct((M, h_pad), hidden_states.dtype),
        grid_spec=pltpu.PrefetchScalarGridSpec(
            num_scalar_prefetch=0,
            grid=grid,
            in_specs=in_specs,
            out_specs=out_specs,
        ),
        compiler_params=pltpu.CompilerParams(
            dimension_semantics=dims,
            vmem_limit_bytes=vmem_limit,
        ),
        cost_estimate=cost,
    )(x2d, w_p, b2d)

    return out2d[:, :H].reshape(B, S, H)


if __name__ == "__main__":
    # Small shapes consistent with the module: batch=2, seq=8, hidden=32.
    B, S, H = 2, 8, 32
    key = jax.random.PRNGKey(0)
    kx, kw, kb = jax.random.split(key, 3)

    hidden_states = jax.random.normal(kx, (B, S, H), dtype=jnp.float32)
    # Deterministic synthetic parameters (not a checkpoint load).
    weight = jax.random.normal(kw, (H, H), dtype=jnp.float32) * 0.02
    bias = jax.random.normal(kb, (H,), dtype=jnp.float32) * 0.02

    ref = jnp.tanh(hidden_states @ weight.T + bias)

    # 1) Full-precision path (faithful to the f32 PyTorch module).
    out = jax.block_until_ready(
        token_pooler(hidden_states, weight, bias, compute_dtype=None))
    assert out.shape == (B, S, H)
    assert jnp.allclose(out, ref, atol=1e-5, rtol=1e-5)

    # 2) bf16 MXU path — looser tolerance.
    out_bf16 = jax.block_until_ready(
        token_pooler(hidden_states, weight, bias, compute_dtype=jnp.bfloat16))
    assert out_bf16.shape == (B, S, H)
    assert jnp.allclose(out_bf16, ref, atol=2e-2, rtol=2e-2)

    # 3) Default "auto" path (bf16 on v5e, f32 elsewhere).
    out_auto = jax.block_until_ready(token_pooler(hidden_states, weight, bias))
    assert jnp.allclose(out_auto, ref, atol=2e-2, rtol=2e-2)

    # 4) Non-aligned shapes: exercises H padding + masked partial M tile.
    B2, S2, H2 = 2, 13, 160
    kx2, kw2, kb2 = jax.random.split(jax.random.PRNGKey(0), 3)
    hs2 = jax.random.normal(kx2, (B2, S2, H2), dtype=jnp.float32)
    w2 = jax.random.normal(kw2, (H2, H2), dtype=jnp.float32) * 0.02
    b2 = jax.random.normal(kb2, (H2,), dtype=jnp.float32) * 0.02
    ref2 = jnp.tanh(hs2 @ w2.T + b2)
    out2 = jax.block_until_ready(token_pooler(hs2, w2, b2, compute_dtype=None))
    assert out2.shape == (B2, S2, H2)
    assert jnp.allclose(out2, ref2, atol=1e-5, rtol=1e-5)

    print("KERNEL_OK")
</pallas_src>

<mosaic_0001>
module attributes {stable_mosaic.version = 11 : i64} {
  func.func @_token_pooler_kernel(%arg0: i32, %arg1: memref<16x128xf32, #tpu.memory_space<vmem>>, %arg2: memref<128x128xf32, #tpu.memory_space<vmem>>, %arg3: memref<1x128xf32, #tpu.memory_space<vmem>>, %arg4: memref<16x128xf32, #tpu.memory_space<vmem>>) attributes {dimension_semantics = [#tpu.dimension_semantics<parallel>], iteration_bounds = array<i64: 1>, scalar_prefetch = 0 : i64, scratch_operands = 0 : i64, tpu.core_type = #tpu.core_type<tc>, window_params = [{transform_indices = @transform_0, window_bounds = array<i64: 16, 128>}, {pipeline_mode = #tpu.pipeline_mode<synchronous>, transform_indices = @transform_1, window_bounds = array<i64: 128, 128>}, {pipeline_mode = #tpu.pipeline_mode<synchronous>, transform_indices = @transform_2, window_bounds = array<i64: 1, 128>}, {transform_indices = @transform_3, window_bounds = array<i64: 16, 128>}]} {
    %c0 = arith.constant 0 : index
    %c0_0 = arith.constant 0 : index
    %0 = vector.load %arg1[%c0, %c0_0] : memref<16x128xf32, #tpu.memory_space<vmem>>, vector<16x128xf32>
    %c0_1 = arith.constant 0 : index
    %c0_2 = arith.constant 0 : index
    %1 = vector.load %arg2[%c0_1, %c0_2] : memref<128x128xf32, #tpu.memory_space<vmem>>, vector<128x128xf32>
    %cst = arith.constant dense<0.000000e+00> : vector<16x128xf32>
    %2 = tpu.matmul %0, %1, %cst {dimension_numbers = #tpu.dot_dimension_numbers<[1], [1], [0], [0], [0, 0, 1, 0], [], []>} : vector<16x128xf32>, vector<128x128xf32>, vector<16x128xf32> -> vector<16x128xf32>
    %c0_3 = arith.constant 0 : index
    %c0_4 = arith.constant 0 : index
    %3 = vector.load %arg3[%c0_3, %c0_4] : memref<1x128xf32, #tpu.memory_space<vmem>>, vector<1x128xf32>
    %4 = vector.broadcast %3 : vector<1x128xf32> to vector<16x128xf32>
    %5 = arith.addf %2, %4 : vector<16x128xf32>
    %6 = math.tanh %5 : vector<16x128xf32>
    %c0_5 = arith.constant 0 : index
    %c0_6 = arith.constant 0 : index
    %7 = vector.load %arg4[%c0_5, %c0_6] : memref<16x128xf32, #tpu.memory_space<vmem>>, vector<16x128xf32>
    tpu.vector_store %arg4[%c0_5, %c0_6], %6 {strides = array<i32>} : memref<16x128xf32, #tpu.memory_space<vmem>>, vector<16x128xf32>,
    return
  }
  func.func @transform_0(%arg0: i32) -> (i32, i32) {
    %c0_i32 = arith.constant 0 : i32
    %c0_i32_0 = arith.constant 0 : i32
    return %arg0, %c0_i32 : i32, i32
  }
  func.func @transform_1(%arg0: i32) -> (i32, i32) {
    %c0_i32 = arith.constant 0 : i32
    %c0_i32_0 = arith.constant 0 : i32
    %c0_i32_1 = arith.constant 0 : i32
    return %c0_i32, %c0_i32_0 : i32, i32
  }
  func.func @transform_2(%arg0: i32) -> (i32, i32) {
    %c0_i32 = arith.constant 0 : i32
    %c0_i32_0 = arith.constant 0 : i32
    %c0_i32_1 = arith.constant 0 : i32
    return %c0_i32, %c0_i32_0 : i32, i32
  }
  func.func @transform_3(%arg0: i32) -> (i32, i32) {
    %c0_i32 = arith.constant 0 : i32
    %c0_i32_0 = arith.constant 0 : i32
    return %arg0, %c0_i32 : i32, i32
  }
}

</mosaic_0001>

<bundles_post_ra>
// kernel: tpu_custom_call.1
= control target key start
LH: loop header
LB: loop body
LE: loop exit
PB: predicated region body
PF: predicated region fallthrough
CT: control target
= control target key end

     0   :  { %8 = vsyncpa [#allocation3], 0  ;;  %s405_s0 = inlined_call_operand.hbm [shape: f32[16,128], index: 0, kind: input, shape index: {}]   ;;  %s406_s1 = inlined_call_operand.hbm [shape: f32[128,128], index: 1, kind: input, shape index: {}]   ;;  %s407_s2 = inlined_call_operand.vmem [shape: f32[1,128], index: 2, kind: input, shape index: {}]   ;;  %s408_s3 = inlined_call_operand.hbm [shape: f32[16,128], index: 3, kind: output, shape index: {}]  }
   0x1   :  { %9 = vsyncpa [#allocation6], 0 }
   0x2   :  { %10 = vsyncpa [#allocation4], 0  ;;  %s332_s12 = smov [#allocation2]   ;;  %s260_s16 = scalar_lea.hbm %s405_s0, 256 }
   0x3   :  { %s16_s13 = sshll.u32 %s332_s12, 4  ;;  %p261_p0 = scmp.ne.s32.totalorder %s405_s0, %s260_s16  ;;  %s17_s13 = int_to_ptr.vmem [resolvable:$true] %s16_s13 }
   0x4   :  { %p264_p1 = scmp.lt.u32.totalorder %s260_s16, %s405_s0 }
   0x6   :  { %p266_p2 = pnand %p264_p1, %p261_p0 }
   0x8   :  { %269 = shalt.err (!%p266_p2)
}
   0x9   :  { %s270_s21 = scalar_lea.vmem %s17_s13, 256  ;;  %p275_p4 = scmp.lt.s32.totalorder %s17_s13, %s17_s13 }
   0xa   :  { %p271_p3 = scmp.ne.s32.totalorder %s17_s13, %s270_s21  ;;  %p276_p5 = scmp.lt.s32.totalorder %s270_s21, %s270_s21 }
   0xc   :  { %p277_p6 = por %p276_p5, %p275_p4 }
   0xe   :  { %p278_p7 = pnand %p277_p6, %p271_p3 }
  0x10   :  { %281 = shalt.err (!%p278_p7)
}
  0x11   :  { %s333_s22 = smov 128   ;;  %s334_s23 = smov 8  }
  0x12   :  { %22 = dma.hbm_to_vmem [thread:$0]  %s405_s0, 256, %s17_s13, [#allocation3], %s333_s22, %s333_s22, %s334_s23  }
  0x13   :  { %s335_s26 = smov [#allocation5]   ;;  %s282_s30 = scalar_lea.hbm %s406_s1, 2048 }
  0x14   :  { %s28_s27 = sshll.u32 %s335_s26, 4  ;;  %p283_p8 = scmp.ne.s32.totalorder %s406_s1, %s282_s30  ;;  %s29_s27 = int_to_ptr.vmem [resolvable:$true] %s28_s27 }
  0x15   :  { %p286_p9 = scmp.lt.u32.totalorder %s282_s30, %s406_s1 }
  0x17   :  { %p288_p10 = pnand %p286_p9, %p283_p8 }
  0x19   :  { %291 = shalt.err (!%p288_p10)
}
  0x1a   :  { %s292_s8 = scalar_lea.vmem %s29_s27, 2048  ;;  %p297_p12 = scmp.lt.s32.totalorder %s29_s27, %s29_s27 }
  0x1b   :  { %p293_p11 = scmp.ne.s32.totalorder %s29_s27, %s292_s8  ;;  %p298_p13 = scmp.lt.s32.totalorder %s292_s8, %s292_s8 }
  0x1d   :  { %p299_p0 = por %p298_p13, %p297_p12 }
  0x1f   :  { %p300_p1 = pnand %p299_p0, %p293_p11 }
  0x21   :  { %303 = shalt.err (!%p300_p1)
}
  0x22   :  { %34 = dma.hbm_to_vmem [thread:$0]  %s406_s1, 2048, %s29_s27, [#allocation6], %s333_s22, %s333_s22, %s334_s23  }
  0x23   :  { %326 = dma.done.wait [#allocation3], 256  }
  0x24   :  { %327 = vsyncadd [#allocation3], 4294967040 }
  0x25   :  { %328 = dma.done.wait [#allocation6], 2048  }
  0x26   :  { %329 = vsyncadd [#allocation6], 4294965248  ;;  %v45_v0 = vld [vmem:[#allocation5] sm:$0xff]  ;;  %v46_v1 = vld [vmem:[#allocation5 + $0x8] sm:$0xff]  ;;  %s336_s11 = smov [#allocation7]  }
  0x27   :  { %v47_v2 = vld [vmem:[#allocation5 + $0x10] sm:$0xff]  ;;  %v219_v3 = vpack.c.bf16 %v46_v1, %v45_v0  ;;  %v48_v4 = vld [vmem:[#allocation5 + $0x18] sm:$0xff]  ;;  %v49_v7 = vld [vmem:[#allocation5 + $0x20] sm:$0xff]  ;;  %s152_s12 = sshll.u32 %s336_s11, 4  ;;  %s153_s12 = int_to_ptr.vmem [resolvable:$true] %s152_s12 }
  0x28   :  { %v223_v5 = vpack.c.bf16 %v48_v4, %v47_v2  ;;  %v43_v6 = vld [vmem:[#allocation2] sm:$0xff]  ;;  %v50_v8 = vld [vmem:[#allocation5 + $0x28] sm:$0xff]  ;;  %v52_v11 = vld [vmem:[#allocation5 + $0x38] sm:$0xff]  ;;  %s304_s13 = scalar_lea.vmem %s153_s12, 256  ;;  %p309_p3 = scmp.lt.s32.totalorder %s153_s12, %s153_s12 }
  0x29   :  { %220 = vmatprep.subr.bf16.mxu0 %v219_v3  ;;  %216 = vmatprep.mubr.f32.mxu0 %v43_v6  ;;  %v227_v9 = vpack.c.bf16 %v50_v8, %v49_v7  ;;  %v51_v10 = vld [vmem:[#allocation5 + $0x30] sm:$0xff]  ;;  %v53_v13 = vld [vmem:[#allocation5 + $0x40] sm:$0xff]  ;;  %v54_v14 = vld [vmem:[#allocation5 + $0x48] sm:$0xff]  ;;  %p305_p2 = scmp.ne.s32.totalorder %s153_s12, %s304_s13  ;;  %p310_p4 = scmp.lt.s32.totalorder %s304_s13, %s304_s13 }
  0x2a   :  { %222 = vmatpush3.bf16.xpose.msra.mxu0 %v219_v3  ;;  %v231_v12 = vpack.c.bf16 %v52_v11, %v51_v10  ;;  %v235_v15 = vpack.c.bf16 %v54_v14, %v53_v13  ;;  %v55_v16 = vld [vmem:[#allocation5 + $0x50] sm:$0xff]  ;;  %v56_v17 = vld [vmem:[#allocation5 + $0x58] sm:$0xff]  ;;  %v57_v19 = vld [vmem:[#allocation5 + $0x60] sm:$0xff] }
  0x2b   :  { %224 = vmatprep.subr.bf16.mxu0 %v223_v5  ;;  %v239_v18 = vpack.c.bf16 %v56_v17, %v55_v16  ;;  %v58_v20 = vld [vmem:[#allocation5 + $0x68] sm:$0xff]  ;;  %v59_v22 = vld [vmem:[#allocation5 + $0x70] sm:$0xff]  ;;  %v60_v23 = vld [vmem:[#allocation5 + $0x78] sm:$0xff]  ;;  %p311_p5 = por %p310_p4, %p309_p3 }
  0x2c   :  { %v243_v21 = vpack.c.bf16 %v58_v20, %v57_v19  ;;  %v247_v24 = vpack.c.bf16 %v60_v23, %v59_v22  ;;  %v44_v25 = vld [vmem:[#allocation2 + $0x8] sm:$0xff]  ;;  %v165_v26 = vld [vmem:[%s407_s2] ss:$0 sm:$0xff] }
  0x2d   :  { %p312_p6 = pnand %p311_p5, %p305_p2 }
  0x32   :  { %226 = vmatpush3.bf16.xpose.msra.mxu0 %v223_v5 }
  0x33   :  { %228 = vmatprep.subr.bf16.mxu0 %v227_v9 }
  0x3a   :  { %230 = vmatpush3.bf16.xpose.msra.mxu0 %v227_v9 }
  0x3b   :  { %232 = vmatprep.subr.bf16.mxu0 %v231_v12 }
  0x42   :  { %234 = vmatpush3.bf16.xpose.msra.mxu0 %v231_v12 }
  0x43   :  { %236 = vmatprep.subr.bf16.mxu0 %v235_v15 }
  0x4a   :  { %238 = vmatpush3.bf16.xpose.msra.mxu0 %v235_v15 }
  0x4b   :  { %240 = vmatprep.subr.bf16.mxu0 %v239_v18 }
  0x52   :  { %242 = vmatpush3.bf16.xpose.msra.mxu0 %v239_v18 }
  0x53   :  { %244 = vmatprep.subr.bf16.mxu0 %v243_v21 }
  0x5a   :  { %246 = vmatpush3.bf16.xpose.msra.mxu0 %v243_v21 }
  0x5b   :  { %248 = vmatprep.subr.bf16.mxu0 %v247_v24 }
  0x62   :  { %250 = vmatpush3.bf16.xpose.msra.mxu0 %v247_v24 }
  0x69   :  { %217 = vmatmul.mubr.f32.vlgmr.msra.gmra.mrb[0].mxu0 %v44_v25 }
 0x13c   :  { %v218_v27 = vpop.f32.mrb[0].mxu0 }
 0x13d   :  { %v140_v28 = vadd.f32 %v218_v27, %v165_v26  ;;  %v134_v29 = vpop.f32.mrb[1].mxu0 }
 0x13e   :  { %v135_v30 = vadd.f32 %v165_v26, %v134_v29 }
 0x13f   :  { %256 = vtanh.f32 %v140_v28 }
 0x140   :  { %258 = vtanh.f32 %v135_v30 }
 0x149   :  { %v257_v31 = vpop.eup %256 }
 0x14a   :  { %v259_v32 = vpop.eup %258  ;;  %146 = vst [vmem:[#allocation7 + $0x8] sm:$0xff] %v257_v31 }
 0x14b   :  { %145 = vst [vmem:[#allocation7] sm:$0xff] %v259_v32 }
 0x14c   :  { %315 = shalt.err (!%p312_p6)
}
 0x14d   :  { %s316_s15 = scalar_lea.hbm %s408_s3, 256 }
 0x14e   :  { %p317_p7 = scmp.ne.s32.totalorder %s408_s3, %s316_s15  ;;  %p320_p8 = scmp.lt.u32.totalorder %s316_s15, %s408_s3 }
 0x150   :  { %p322_p9 = pnand %p320_p8, %p317_p7 }
 0x152   :  { %325 = shalt.err (!%p322_p9)
}
 0x153   :  { %158 = dma.vmem_to_hbm [thread:$0]  %s153_s12, 256, %s408_s3, [#allocation4], %s333_s22, %s333_s22, %s334_s23  }
 0x154   :  { %330 = dma.done.wait [#allocation4], 256  }
 0x155   :  { %331 = vsyncadd [#allocation4], 4294967040 }
 0x156   :  { %162 = vsyncpa [#allocation3], 1 }
 0x157   :  { %163 = vsyncpa [#allocation6], 1 }
 0x158   :  { %164 = vsyncpa [#allocation4], 1 }

</bundles_post_ra>
